<compile_context>
chip_gen: v5e
topology: v5e:2x2
jax: 0.10.0
libtpu: 0.0.40
codegen_flags: <defaults>
</compile_context>

<pallas_src>
import functools

import jax
import jax.numpy as jnp
from jax import lax
from jax.experimental import pallas as pl
from jax.experimental.pallas import tpu as pltpu


_SQRT_2_OVER_PI = 0.7978845608028654
_GELU_COEF = 0.044715


def _gelu_tanh(h, use_bf16):
    # nn.GELU(approximate='tanh'):
    #   0.5 * x * (1 + tanh( sqrt(2/pi) * (x + 0.044715 * x^3) ))
    if use_bf16:
        h = h.astype(jnp.bfloat16)
    return 0.5 * h * (1.0 + jnp.tanh(_SQRT_2_OVER_PI * (h + _GELU_COEF * (h * h * h))))


def _mlp_kernel_resident(x_ref, w1_ref, b1_ref, w2_ref, b2_ref, o_ref, acc_ref,
                         *, th, n_chunks, use_bf16_gelu):
    # x_ref:  (tm, C) f32 row tile     w1_ref: (C, H) bf16 (resident)
    # b1_ref: (1, H)  f32              w2_ref: (H, C) bf16 (resident)
    # b2_ref: (1, C)  f32              o_ref:  (tm, C) f32
    # acc_ref: (tm, C) f32 VMEM scratch accumulator
    x = x_ref[...].astype(jnp.bfloat16)
    acc_ref[...] = jnp.zeros_like(acc_ref)

    def body(ck, carry):
        off = pl.multiple_of(ck * th, th)
        h = jnp.dot(x, w1_ref[:, pl.ds(off, th)],
                    preferred_element_type=jnp.float32) + b1_ref[:, pl.ds(off, th)]
        g = _gelu_tanh(h, use_bf16_gelu)
        acc_ref[...] += jnp.dot(g.astype(jnp.bfloat16), w2_ref[pl.ds(off, th), :],
                                preferred_element_type=jnp.float32)
        return carry

    lax.fori_loop(0, n_chunks, body, 0, unroll=True)
    o_ref[...] = (acc_ref[...] + b2_ref[...]).astype(o_ref.dtype)


def _mlp_kernel_streamed(x_ref, w1_ref, b1_ref, w2_ref, b2_ref, o_ref, acc_ref,
                         *, use_bf16_gelu):
    # Grid = (M tiles, H chunks).  Weight blocks are streamed per H chunk:
    # w1_ref: (C, th) bf16, w2_ref: (th, C) bf16, b1_ref: (1, th) f32.
    k = pl.program_id(1)

    @pl.when(k == 0)
    def _():
        acc_ref[...] = jnp.zeros_like(acc_ref)

    x = x_ref[...].astype(jnp.bfloat16)
    h = jnp.dot(x, w1_ref[...], preferred_element_type=jnp.float32) + b1_ref[...]
    g = _gelu_tanh(h, use_bf16_gelu)
    acc_ref[...] += jnp.dot(g.astype(jnp.bfloat16), w2_ref[...],
                            preferred_element_type=jnp.float32)

    @pl.when(k == pl.num_programs(1) - 1)
    def _():
        o_ref[...] = (acc_ref[...] + b2_ref[...]).astype(o_ref.dtype)


def _round_up(n, m):
    return ((n + m - 1) // m) * m


def _vmem_capacity_bytes():
    try:
        return int(pltpu.get_tpu_info().vmem_capacity_bytes)
    except Exception:
        return 64 * 1024 * 1024  # v7x floor -> safe clamp on every generation


def _bf16_vector_units():
    # bf16 VPU/EUP exist on v6e and newer; v5e and older keep GELU in f32.
    try:
        kind = jax.devices()[0].device_kind.lower()
    except Exception:
        return False
    return not any(tag in kind for tag in ("v2", "v3", "v4", "v5"))


def _pick_hidden_chunk(H):
    for th in (1024, 512, 256, 128):
        if th <= H and H % th == 0:
            return th
    return H  # tiny / odd H: single chunk (degenerates to the monolithic form)


@functools.partial(
    jax.jit,
    static_argnames=("tm", "th", "use_bf16_gelu", "streaming", "vmem_cap"))
def _mlp_forward_impl(x, w_fc, b_fc, w_proj, b_proj, *, tm, th, use_bf16_gelu,
                      streaming, vmem_cap):
    B, T, C = x.shape
    H = w_fc.shape[1]
    M = B * T
    grid_m = pl.cdiv(M, tm)
    n_chunks = H // th

    xf = x.reshape(M, C)  # free reshape; stays f32 (cast to bf16 in-kernel)
    # No-ops when the caller already stores bf16 weights (recommended).
    w1 = w_fc if w_fc.dtype == jnp.bfloat16 else w_fc.astype(jnp.bfloat16)
    w2 = w_proj if w_proj.dtype == jnp.bfloat16 else w_proj.astype(jnp.bfloat16)
    b1 = b_fc.reshape(1, H).astype(jnp.float32)
    b2 = b_proj.reshape(1, C).astype(jnp.float32)

    # VMEM footprint (+40% headroom), clamped to 90% of physical VMEM.
    if streaming:
        bytes_needed = (
            2 * (C * th + th * C) * 2   # double-buffered bf16 weight chunks
            + 2 * (th + C) * 4          # bias blocks
            + 2 * tm * C * 4            # x tiles (f32, double-buffered)
            + 2 * tm * C * 4            # out tiles (f32, double-buffered)
            + tm * C * 4                # f32 accumulator scratch
            + 2 * tm * th * 4           # (tm, th) chunk intermediate + slack
        )
    else:
        bytes_needed = (
            2 * C * H * 2               # resident bf16 weights (single-buffered)
            + 2 * (H + C) * 4           # biases
            + 2 * tm * C * 4            # x tiles
            + 2 * tm * C * 4            # out tiles
            + tm * C * 4                # accumulator scratch
            + 2 * tm * th * 4           # chunk intermediate + slack
        )
    vmem_limit = int(min(max(int(bytes_needed * 1.4), 32 * 1024 * 1024),
                         int(0.9 * vmem_cap)))

    weight_reads = grid_m if streaming else 1
    cost = pl.CostEstimate(
        flops=4 * M * C * H,                    # two matmuls, 2*M*C*H each
        transcendentals=M * H,                  # tanh in GELU
        bytes_accessed=(M * C * 4               # x in (f32)
                        + M * C * 4             # out (f32)
                        + weight_reads * 2 * C * H * 2   # bf16 weights
                        + (H + C) * 4),         # biases
    )

    out_shape = jax.ShapeDtypeStruct((M, C), x.dtype)
    out_spec = None

    if not streaming:
        kernel = functools.partial(_mlp_kernel_resident, th=th,
                                   n_chunks=n_chunks,
                                   use_bf16_gelu=use_bf16_gelu)
        out = pl.pallas_call(
            kernel,
            out_shape=out_shape,
            grid_spec=pltpu.PrefetchScalarGridSpec(
                num_scalar_prefetch=0,
                grid=(grid_m,),
                in_specs=[
                    pl.BlockSpec((tm, C), lambda i: (i, 0)),      # x row tile
                    pl.BlockSpec((C, H), lambda i: (0, 0),        # W_fc resident
                                 pipeline_mode=pl.Buffered(1)),
                    pl.BlockSpec((1, H), lambda i: (0, 0),        # b_fc
                                 pipeline_mode=pl.Buffered(1)),
                    pl.BlockSpec((H, C), lambda i: (0, 0),        # W_proj resident
                                 pipeline_mode=pl.Buffered(1)),
                    pl.BlockSpec((1, C), lambda i: (0, 0),        # b_proj
                                 pipeline_mode=pl.Buffered(1)),
                ],
                out_specs=pl.BlockSpec((tm, C), lambda i: (i, 0)),
                scratch_shapes=[pltpu.VMEM((tm, C), jnp.float32)],
            ),
            compiler_params=pltpu.CompilerParams(
                dimension_semantics=("parallel",),
                vmem_limit_bytes=vmem_limit),
            cost_estimate=cost,
        )(xf, w1, b1, w2, b2)
    else:
        kernel = functools.partial(_mlp_kernel_streamed,
                                   use_bf16_gelu=use_bf16_gelu)
        out = pl.pallas_call(
            kernel,
            out_shape=out_shape,
            grid_spec=pltpu.PrefetchScalarGridSpec(
                num_scalar_prefetch=0,
                grid=(grid_m, n_chunks),
                in_specs=[
                    pl.BlockSpec((tm, C), lambda i, k: (i, 0)),   # x row tile
                    pl.BlockSpec((C, th), lambda i, k: (0, k)),   # W_fc chunk
                    pl.BlockSpec((1, th), lambda i, k: (0, k)),   # b_fc chunk
                    pl.BlockSpec((th, C), lambda i, k: (k, 0)),   # W_proj chunk
                    pl.BlockSpec((1, C), lambda i, k: (0, 0)),    # b_proj
                ],
                out_specs=pl.BlockSpec((tm, C), lambda i, k: (i, 0)),
                scratch_shapes=[pltpu.VMEM((tm, C), jnp.float32)],
            ),
            compiler_params=pltpu.CompilerParams(
                dimension_semantics=("parallel", "arbitrary"),
                vmem_limit_bytes=vmem_limit),
            cost_estimate=cost,
        )(xf, w1, b1, w2, b2)

    return out.reshape(B, T, C)


def mlp_forward(x, w_fc, b_fc, w_proj, b_proj, *, tm=256, th=None,
                use_bf16_gelu=None, force_streaming=None):
    """x: (B, T, C). w_fc: (C, 4C), b_fc: (4C,), w_proj: (4C, C), b_proj: (C,).

    For best decode performance, pass w_fc / w_proj already cast to bf16 (once,
    outside this function) so no per-call weight conversion pass is needed.
    """
    B, T, C = x.shape
    H = w_fc.shape[1]
    M = B * T

    # Row tile: collapse for small M (decode) so the grid is one step; keep a
    # multiple of 16 so the in-kernel bf16-cast tile stays natively packed.
    tm = max(16, min(tm, _round_up(M, 16)))

    if th is None:
        th = _pick_hidden_chunk(H)
    assert H % th == 0, "hidden chunk must divide H exactly (no ragged reduce)"

    if use_bf16_gelu is None:
        use_bf16_gelu = _bf16_vector_units()

    vmem_cap = _vmem_capacity_bytes()
    weight_bytes_bf16 = 2 * C * H * 2
    if force_streaming is None:
        # Stream the weights (v7x, GPT-2 medium+) when they would not fit
        # comfortably resident in VMEM; otherwise keep them resident so they
        # are read from HBM exactly once per call.
        streaming = weight_bytes_bf16 > int(0.4 * vmem_cap)
    else:
        streaming = bool(force_streaming)

    return _mlp_forward_impl(x, w_fc, b_fc, w_proj, b_proj,
                             tm=int(tm), th=int(th),
                             use_bf16_gelu=bool(use_bf16_gelu),
                             streaming=streaming, vmem_cap=int(vmem_cap))


def _reference(x, w_fc, b_fc, w_proj, b_proj):
    h = jnp.einsum("btc,ch->bth", x, w_fc) + b_fc
    c = 0.7978845608028654
    h = 0.5 * h * (1.0 + jnp.tanh(c * (h + 0.044715 * h ** 3)))
    return jnp.einsum("bth,hc->btc", h, w_proj) + b_proj


if __name__ == "__main__":
    # Small shapes consistent with the module (n_embd scaled down from 768).
    B, T, C = 2, 8, 128        # batch, seq, n_embd
    H = 4 * C                  # 4 * n_embd

    key = jax.random.PRNGKey(0)
    kx, k1, k2, k3, k4 = jax.random.split(key, 5)

    x = jax.random.normal(kx, (B, T, C), dtype=jnp.float32)
    # Deterministic param init (stand-in for nn.Linear init; transposed layout).
    w_fc = jax.random.normal(k1, (C, H), dtype=jnp.float32) * 0.02
    b_fc = jax.random.normal(k2, (H,), dtype=jnp.float32) * 0.02
    w_proj = jax.random.normal(k3, (H, C), dtype=jnp.float32) * 0.02
    b_proj = jax.random.normal(k4, (C,), dtype=jnp.float32) * 0.02

    # Pre-cast the weights to bf16 once (outside jit) -- per-call weight casts
    # would quadruple weight HBM traffic on the decode path.
    w_fc_bf16 = w_fc.astype(jnp.bfloat16)
    w_proj_bf16 = w_proj.astype(jnp.bfloat16)

    ref = _reference(x, w_fc, b_fc, w_proj, b_proj)

    # Path 1: resident weights + in-kernel H-chunked accumulation (th=128 so
    # the chunk loop runs 4 iterations at this test size).
    out_res = mlp_forward(x, w_fc_bf16, b_fc, w_proj_bf16, b_proj,
                          th=128, force_streaming=False)
    out_res = jax.block_until_ready(out_res)
    assert out_res.shape == (B, T, C)
    # Loose tolerance: bf16 MXU operands (x, W1, W2, dot2 input) by design.
    assert jnp.allclose(out_res, ref, atol=2e-2, rtol=2e-2), \
        "resident-path mismatch vs reference"

    # Path 2: H-streamed weights (second grid axis), the large-C / v7x path.
    out_str = mlp_forward(x, w_fc_bf16, b_fc, w_proj_bf16, b_proj,
                          th=128, force_streaming=True)
    out_str = jax.block_until_ready(out_str)
    assert out_str.shape == (B, T, C)
    assert jnp.allclose(out_str, ref, atol=2e-2, rtol=2e-2), \
        "streamed-path mismatch vs reference"

    print("KERNEL_OK")
</pallas_src>

<mosaic_0001>
module attributes {stable_mosaic.version = 11 : i64} {
  func.func @_mlp_kernel_resident(%arg0: i32, %arg1: memref<16x128xf32, #tpu.memory_space<vmem>>, %arg2: memref<128x512xbf16, #tpu.memory_space<vmem>>, %arg3: memref<1x512xf32, #tpu.memory_space<vmem>>, %arg4: memref<512x128xbf16, #tpu.memory_space<vmem>>, %arg5: memref<1x128xf32, #tpu.memory_space<vmem>>, %arg6: memref<16x128xf32, #tpu.memory_space<vmem>>, %arg7: memref<16x128xf32, #tpu.memory_space<vmem>>) attributes {dimension_semantics = [#tpu.dimension_semantics<parallel>], iteration_bounds = array<i64: 1>, scalar_prefetch = 0 : i64, scratch_operands = 1 : i64, tpu.core_type = #tpu.core_type<tc>, window_params = [{transform_indices = @transform_0, window_bounds = array<i64: 16, 128>}, {pipeline_mode = #tpu.pipeline_mode<synchronous>, transform_indices = @transform_1, window_bounds = array<i64: 128, 512>}, {pipeline_mode = #tpu.pipeline_mode<synchronous>, transform_indices = @transform_2, window_bounds = array<i64: 1, 512>}, {pipeline_mode = #tpu.pipeline_mode<synchronous>, transform_indices = @transform_3, window_bounds = array<i64: 512, 128>}, {pipeline_mode = #tpu.pipeline_mode<synchronous>, transform_indices = @transform_4, window_bounds = array<i64: 1, 128>}, {transform_indices = @transform_5, window_bounds = array<i64: 16, 128>}]} {
    %c0 = arith.constant 0 : index
    %c0_0 = arith.constant 0 : index
    %0 = vector.load %arg1[%c0, %c0_0] : memref<16x128xf32, #tpu.memory_space<vmem>>, vector<16x128xf32>
    %1 = arith.truncf %0 : vector<16x128xf32> to vector<16x128xbf16>
    %cst = arith.constant 0.000000e+00 : f32
    %2 = vector.broadcast %cst : f32 to vector<16x128xf32>
    %c0_1 = arith.constant 0 : index
    %c0_2 = arith.constant 0 : index
    %3 = vector.load %arg7[%c0_1, %c0_2] : memref<16x128xf32, #tpu.memory_space<vmem>>, vector<16x128xf32>
    tpu.vector_store %arg7[%c0_1, %c0_2], %2 {strides = array<i32>} : memref<16x128xf32, #tpu.memory_space<vmem>>, vector<16x128xf32>,
    %c0_i32 = arith.constant 0 : i32
    %c128_i32 = arith.constant 128 : i32
    %4 = arith.muli %c0_i32, %c128_i32 : i32
    %5 = tpu.assume_multiple %4, 128 : i32
    %c0_3 = arith.constant 0 : index
    %6 = arith.index_cast %5 : i32 to index
    %7 = vector.load %arg2[%c0_3, %6] : memref<128x512xbf16, #tpu.memory_space<vmem>>, vector<128x128xbf16>
    %cst_4 = arith.constant dense<0.000000e+00> : vector<16x128xf32>
    %8 = tpu.matmul %1, %7, %cst_4 {dimension_numbers = #tpu.dot_dimension_numbers<[1], [0], [0], [1], [0, 0, 1, 1], [], []>} : vector<16x128xbf16>, vector<128x128xbf16>, vector<16x128xf32> -> vector<16x128xf32>
    %c0_5 = arith.constant 0 : index
    %9 = arith.index_cast %5 : i32 to index
    %10 = vector.load %arg3[%c0_5, %9] : memref<1x512xf32, #tpu.memory_space<vmem>>, vector<1x128xf32>
    %11 = vector.broadcast %10 : vector<1x128xf32> to vector<16x128xf32>
    %12 = arith.addf %8, %11 : vector<16x128xf32>
    %13 = arith.truncf %12 : vector<16x128xf32> to vector<16x128xbf16>
    %cst_6 = arith.constant 5.000000e-01 : bf16
    %14 = vector.broadcast %cst_6 : bf16 to vector<16x128xbf16>
    %15 = arith.mulf %14, %13 : vector<16x128xbf16>
    %16 = arith.mulf %13, %13 : vector<16x128xbf16>
    %17 = arith.mulf %16, %13 : vector<16x128xbf16>
    %cst_7 = arith.constant 4.467770e-02 : bf16
    %18 = vector.broadcast %cst_7 : bf16 to vector<16x128xbf16>
    %19 = arith.mulf %18, %17 : vector<16x128xbf16>
    %20 = arith.addf %13, %19 : vector<16x128xbf16>
    %cst_8 = arith.constant 7.968750e-01 : bf16
    %21 = vector.broadcast %cst_8 : bf16 to vector<16x128xbf16>
    %22 = arith.mulf %21, %20 : vector<16x128xbf16>
    %23 = math.tanh %22 : vector<16x128xbf16>
    %cst_9 = arith.constant 1.000000e+00 : bf16
    %24 = vector.broadcast %cst_9 : bf16 to vector<16x128xbf16>
    %25 = arith.addf %24, %23 : vector<16x128xbf16>
    %26 = arith.mulf %15, %25 : vector<16x128xbf16>
    %c0_10 = arith.constant 0 : index
    %c0_11 = arith.constant 0 : index
    %27 = vector.load %arg7[%c0_10, %c0_11] : memref<16x128xf32, #tpu.memory_space<vmem>>, vector<16x128xf32>
    %28 = arith.index_cast %5 : i32 to index
    %c0_12 = arith.constant 0 : index
    %29 = vector.load %arg4[%28, %c0_12] : memref<512x128xbf16, #tpu.memory_space<vmem>>, vector<128x128xbf16>
    %cst_13 = arith.constant dense<0.000000e+00> : vector<16x128xf32>
    %30 = tpu.matmul %26, %29, %cst_13 {dimension_numbers = #tpu.dot_dimension_numbers<[1], [0], [0], [1], [0, 0, 1, 1], [], []>} : vector<16x128xbf16>, vector<128x128xbf16>, vector<16x128xf32> -> vector<16x128xf32>
    %31 = arith.addf %27, %30 : vector<16x128xf32>
    %c0_14 = arith.constant 0 : index
    %c0_15 = arith.constant 0 : index
    %32 = vector.load %arg7[%c0_14, %c0_15] : memref<16x128xf32, #tpu.memory_space<vmem>>, vector<16x128xf32>
    tpu.vector_store %arg7[%c0_14, %c0_15], %31 {strides = array<i32>} : memref<16x128xf32, #tpu.memory_space<vmem>>, vector<16x128xf32>,
    %c1_i32 = arith.constant 1 : i32
    %c128_i32_16 = arith.constant 128 : i32
    %33 = arith.muli %c1_i32, %c128_i32_16 : i32
    %34 = tpu.assume_multiple %33, 128 : i32
    %c0_17 = arith.constant 0 : index
    %35 = arith.index_cast %34 : i32 to index
    %36 = vector.load %arg2[%c0_17, %35] : memref<128x512xbf16, #tpu.memory_space<vmem>>, vector<128x128xbf16>
    %cst_18 = arith.constant dense<0.000000e+00> : vector<16x128xf32>
    %37 = tpu.matmul %1, %36, %cst_18 {dimension_numbers = #tpu.dot_dimension_numbers<[1], [0], [0], [1], [0, 0, 1, 1], [], []>} : vector<16x128xbf16>, vector<128x128xbf16>, vector<16x128xf32> -> vector<16x128xf32>
    %c0_19 = arith.constant 0 : index
    %38 = arith.index_cast %34 : i32 to index
    %39 = vector.load %arg3[%c0_19, %38] : memref<1x512xf32, #tpu.memory_space<vmem>>, vector<1x128xf32>
    %40 = vector.broadcast %39 : vector<1x128xf32> to vector<16x128xf32>
    %41 = arith.addf %37, %40 : vector<16x128xf32>
    %42 = arith.truncf %41 : vector<16x128xf32> to vector<16x128xbf16>
    %cst_20 = arith.constant 5.000000e-01 : bf16
    %43 = vector.broadcast %cst_20 : bf16 to vector<16x128xbf16>
    %44 = arith.mulf %43, %42 : vector<16x128xbf16>
    %45 = arith.mulf %42, %42 : vector<16x128xbf16>
    %46 = arith.mulf %45, %42 : vector<16x128xbf16>
    %cst_21 = arith.constant 4.467770e-02 : bf16
    %47 = vector.broadcast %cst_21 : bf16 to vector<16x128xbf16>
    %48 = arith.mulf %47, %46 : vector<16x128xbf16>
    %49 = arith.addf %42, %48 : vector<16x128xbf16>
    %cst_22 = arith.constant 7.968750e-01 : bf16
    %50 = vector.broadcast %cst_22 : bf16 to vector<16x128xbf16>
    %51 = arith.mulf %50, %49 : vector<16x128xbf16>
    %52 = math.tanh %51 : vector<16x128xbf16>
    %cst_23 = arith.constant 1.000000e+00 : bf16
    %53 = vector.broadcast %cst_23 : bf16 to vector<16x128xbf16>
    %54 = arith.addf %53, %52 : vector<16x128xbf16>
    %55 = arith.mulf %44, %54 : vector<16x128xbf16>
    %c0_24 = arith.constant 0 : index
    %c0_25 = arith.constant 0 : index
    %56 = vector.load %arg7[%c0_24, %c0_25] : memref<16x128xf32, #tpu.memory_space<vmem>>, vector<16x128xf32>
    %57 = arith.index_cast %34 : i32 to index
    %c0_26 = arith.constant 0 : index
    %58 = vector.load %arg4[%57, %c0_26] : memref<512x128xbf16, #tpu.memory_space<vmem>>, vector<128x128xbf16>
    %cst_27 = arith.constant dense<0.000000e+00> : vector<16x128xf32>
    %59 = tpu.matmul %55, %58, %cst_27 {dimension_numbers = #tpu.dot_dimension_numbers<[1], [0], [0], [1], [0, 0, 1, 1], [], []>} : vector<16x128xbf16>, vector<128x128xbf16>, vector<16x128xf32> -> vector<16x128xf32>
    %60 = arith.addf %56, %59 : vector<16x128xf32>
    %c0_28 = arith.constant 0 : index
    %c0_29 = arith.constant 0 : index
    %61 = vector.load %arg7[%c0_28, %c0_29] : memref<16x128xf32, #tpu.memory_space<vmem>>, vector<16x128xf32>
    tpu.vector_store %arg7[%c0_28, %c0_29], %60 {strides = array<i32>} : memref<16x128xf32, #tpu.memory_space<vmem>>, vector<16x128xf32>,
    %c2_i32 = arith.constant 2 : i32
    %c128_i32_30 = arith.constant 128 : i32
    %62 = arith.muli %c2_i32, %c128_i32_30 : i32
    %63 = tpu.assume_multiple %62, 128 : i32
    %c0_31 = arith.constant 0 : index
    %64 = arith.index_cast %63 : i32 to index
    %65 = vector.load %arg2[%c0_31, %64] : memref<128x512xbf16, #tpu.memory_space<vmem>>, vector<128x128xbf16>
    %cst_32 = arith.constant dense<0.000000e+00> : vector<16x128xf32>
    %66 = tpu.matmul %1, %65, %cst_32 {dimension_numbers = #tpu.dot_dimension_numbers<[1], [0], [0], [1], [0, 0, 1, 1], [], []>} : vector<16x128xbf16>, vector<128x128xbf16>, vector<16x128xf32> -> vector<16x128xf32>
    %c0_33 = arith.constant 0 : index
    %67 = arith.index_cast %63 : i32 to index
    %68 = vector.load %arg3[%c0_33, %67] : memref<1x512xf32, #tpu.memory_space<vmem>>, vector<1x128xf32>
    %69 = vector.broadcast %68 : vector<1x128xf32> to vector<16x128xf32>
    %70 = arith.addf %66, %69 : vector<16x128xf32>
    %71 = arith.truncf %70 : vector<16x128xf32> to vector<16x128xbf16>
    %cst_34 = arith.constant 5.000000e-01 : bf16
    %72 = vector.broadcast %cst_34 : bf16 to vector<16x128xbf16>
    %73 = arith.mulf %72, %71 : vector<16x128xbf16>
    %74 = arith.mulf %71, %71 : vector<16x128xbf16>
    %75 = arith.mulf %74, %71 : vector<16x128xbf16>
    %cst_35 = arith.constant 4.467770e-02 : bf16
    %76 = vector.broadcast %cst_35 : bf16 to vector<16x128xbf16>
    %77 = arith.mulf %76, %75 : vector<16x128xbf16>
    %78 = arith.addf %71, %77 : vector<16x128xbf16>
    %cst_36 = arith.constant 7.968750e-01 : bf16
    %79 = vector.broadcast %cst_36 : bf16 to vector<16x128xbf16>
    %80 = arith.mulf %79, %78 : vector<16x128xbf16>
    %81 = math.tanh %80 : vector<16x128xbf16>
    %cst_37 = arith.constant 1.000000e+00 : bf16
    %82 = vector.broadcast %cst_37 : bf16 to vector<16x128xbf16>
    %83 = arith.addf %82, %81 : vector<16x128xbf16>
    %84 = arith.mulf %73, %83 : vector<16x128xbf16>
    %c0_38 = arith.constant 0 : index
    %c0_39 = arith.constant 0 : index
    %85 = vector.load %arg7[%c0_38, %c0_39] : memref<16x128xf32, #tpu.memory_space<vmem>>, vector<16x128xf32>
    %86 = arith.index_cast %63 : i32 to index
    %c0_40 = arith.constant 0 : index
    %87 = vector.load %arg4[%86, %c0_40] : memref<512x128xbf16, #tpu.memory_space<vmem>>, vector<128x128xbf16>
    %cst_41 = arith.constant dense<0.000000e+00> : vector<16x128xf32>
    %88 = tpu.matmul %84, %87, %cst_41 {dimension_numbers = #tpu.dot_dimension_numbers<[1], [0], [0], [1], [0, 0, 1, 1], [], []>} : vector<16x128xbf16>, vector<128x128xbf16>, vector<16x128xf32> -> vector<16x128xf32>
    %89 = arith.addf %85, %88 : vector<16x128xf32>
    %c0_42 = arith.constant 0 : index
    %c0_43 = arith.constant 0 : index
    %90 = vector.load %arg7[%c0_42, %c0_43] : memref<16x128xf32, #tpu.memory_space<vmem>>, vector<16x128xf32>
    tpu.vector_store %arg7[%c0_42, %c0_43], %89 {strides = array<i32>} : memref<16x128xf32, #tpu.memory_space<vmem>>, vector<16x128xf32>,
    %c3_i32 = arith.constant 3 : i32
    %c128_i32_44 = arith.constant 128 : i32
    %91 = arith.muli %c3_i32, %c128_i32_44 : i32
    %92 = tpu.assume_multiple %91, 128 : i32
    %c0_45 = arith.constant 0 : index
    %93 = arith.index_cast %92 : i32 to index
    %94 = vector.load %arg2[%c0_45, %93] : memref<128x512xbf16, #tpu.memory_space<vmem>>, vector<128x128xbf16>
    %cst_46 = arith.constant dense<0.000000e+00> : vector<16x128xf32>
    %95 = tpu.matmul %1, %94, %cst_46 {dimension_numbers = #tpu.dot_dimension_numbers<[1], [0], [0], [1], [0, 0, 1, 1], [], []>} : vector<16x128xbf16>, vector<128x128xbf16>, vector<16x128xf32> -> vector<16x128xf32>
    %c0_47 = arith.constant 0 : index
    %96 = arith.index_cast %92 : i32 to index
    %97 = vector.load %arg3[%c0_47, %96] : memref<1x512xf32, #tpu.memory_space<vmem>>, vector<1x128xf32>
    %98 = vector.broadcast %97 : vector<1x128xf32> to vector<16x128xf32>
    %99 = arith.addf %95, %98 : vector<16x128xf32>
    %100 = arith.truncf %99 : vector<16x128xf32> to vector<16x128xbf16>
    %cst_48 = arith.constant 5.000000e-01 : bf16
    %101 = vector.broadcast %cst_48 : bf16 to vector<16x128xbf16>
    %102 = arith.mulf %101, %100 : vector<16x128xbf16>
    %103 = arith.mulf %100, %100 : vector<16x128xbf16>
    %104 = arith.mulf %103, %100 : vector<16x128xbf16>
    %cst_49 = arith.constant 4.467770e-02 : bf16
    %105 = vector.broadcast %cst_49 : bf16 to vector<16x128xbf16>
    %106 = arith.mulf %105, %104 : vector<16x128xbf16>
    %107 = arith.addf %100, %106 : vector<16x128xbf16>
    %cst_50 = arith.constant 7.968750e-01 : bf16
    %108 = vector.broadcast %cst_50 : bf16 to vector<16x128xbf16>
    %109 = arith.mulf %108, %107 : vector<16x128xbf16>
    %110 = math.tanh %109 : vector<16x128xbf16>
    %cst_51 = arith.constant 1.000000e+00 : bf16
    %111 = vector.broadcast %cst_51 : bf16 to vector<16x128xbf16>
    %112 = arith.addf %111, %110 : vector<16x128xbf16>
    %113 = arith.mulf %102, %112 : vector<16x128xbf16>
    %c0_52 = arith.constant 0 : index
    %c0_53 = arith.constant 0 : index
    %114 = vector.load %arg7[%c0_52, %c0_53] : memref<16x128xf32, #tpu.memory_space<vmem>>, vector<16x128xf32>
    %115 = arith.index_cast %92 : i32 to index
    %c0_54 = arith.constant 0 : index
    %116 = vector.load %arg4[%115, %c0_54] : memref<512x128xbf16, #tpu.memory_space<vmem>>, vector<128x128xbf16>
    %cst_55 = arith.constant dense<0.000000e+00> : vector<16x128xf32>
    %117 = tpu.matmul %113, %116, %cst_55 {dimension_numbers = #tpu.dot_dimension_numbers<[1], [0], [0], [1], [0, 0, 1, 1], [], []>} : vector<16x128xbf16>, vector<128x128xbf16>, vector<16x128xf32> -> vector<16x128xf32>
    %118 = arith.addf %114, %117 : vector<16x128xf32>
    %c0_56 = arith.constant 0 : index
    %c0_57 = arith.constant 0 : index
    %119 = vector.load %arg7[%c0_56, %c0_57] : memref<16x128xf32, #tpu.memory_space<vmem>>, vector<16x128xf32>
    tpu.vector_store %arg7[%c0_56, %c0_57], %118 {strides = array<i32>} : memref<16x128xf32, #tpu.memory_space<vmem>>, vector<16x128xf32>,
    %c4_i32 = arith.constant 4 : i32
    %c0_58 = arith.constant 0 : index
    %c0_59 = arith.constant 0 : index
    %120 = vector.load %arg7[%c0_58, %c0_59] : memref<16x128xf32, #tpu.memory_space<vmem>>, vector<16x128xf32>
    %c0_60 = arith.constant 0 : index
    %c0_61 = arith.constant 0 : index
    %121 = vector.load %arg5[%c0_60, %c0_61] : memref<1x128xf32, #tpu.memory_space<vmem>>, vector<1x128xf32>
    %122 = vector.broadcast %121 : vector<1x128xf32> to vector<16x128xf32>
    %123 = arith.addf %120, %122 : vector<16x128xf32>
    %c0_62 = arith.constant 0 : index
    %c0_63 = arith.constant 0 : index
    %124 = vector.load %arg6[%c0_62, %c0_63] : memref<16x128xf32, #tpu.memory_space<vmem>>, vector<16x128xf32>
    tpu.vector_store %arg6[%c0_62, %c0_63], %123 {strides = array<i32>} : memref<16x128xf32, #tpu.memory_space<vmem>>, vector<16x128xf32>,
    return
  }
  func.func @transform_0(%arg0: i32) -> (i32, i32) {
    %c0_i32 = arith.constant 0 : i32
    %c0_i32_0 = arith.constant 0 : i32
    return %arg0, %c0_i32 : i32, i32
  }
  func.func @transform_1(%arg0: i32) -> (i32, i32) {
    %c0_i32 = arith.constant 0 : i32
    %c0_i32_0 = arith.constant 0 : i32
    %c0_i32_1 = arith.constant 0 : i32
    return %c0_i32, %c0_i32_0 : i32, i32
  }
  func.func @transform_2(%arg0: i32) -> (i32, i32) {
    %c0_i32 = arith.constant 0 : i32
    %c0_i32_0 = arith.constant 0 : i32
    %c0_i32_1 = arith.constant 0 : i32
    return %c0_i32, %c0_i32_0 : i32, i32
  }
  func.func @transform_3(%arg0: i32) -> (i32, i32) {
    %c0_i32 = arith.constant 0 : i32
    %c0_i32_0 = arith.constant 0 : i32
    %c0_i32_1 = arith.constant 0 : i32
    return %c0_i32, %c0_i32_0 : i32, i32
  }
  func.func @transform_4(%arg0: i32) -> (i32, i32) {
    %c0_i32 = arith.constant 0 : i32
    %c0_i32_0 = arith.constant 0 : i32
    %c0_i32_1 = arith.constant 0 : i32
    return %c0_i32, %c0_i32_0 : i32, i32
  }
  func.func @transform_5(%arg0: i32) -> (i32, i32) {
    %c0_i32 = arith.constant 0 : i32
    %c0_i32_0 = arith.constant 0 : i32
    return %arg0, %c0_i32 : i32, i32
  }
}

</mosaic_0001>

<bundles_post_ra>
// kernel: _mlp_forward_impl.1
= control target key start
LH: loop header
LB: loop body
LE: loop exit
PB: predicated region body
PF: predicated region fallthrough
CT: control target
= control target key end

     0   :  { %10 = vsyncpa [#allocation4], 0  ;;  %s1581_s0 = inlined_call_operand.hbm [shape: f32[16,128], index: 0, kind: input, shape index: {}]   ;;  %s1582_s1 = inlined_call_operand.hbm [shape: bf16[128,512], index: 1, kind: input, shape index: {}]   ;;  %s1583_s2 = inlined_call_operand.vmem [shape: f32[1,512], index: 2, kind: input, shape index: {}]   ;;  %s1584_s3 = inlined_call_operand.hbm [shape: bf16[512,128], index: 3, kind: input, shape index: {}]   ;;  %s1585_s4 = inlined_call_operand.vmem [shape: f32[1,128], index: 4, kind: input, shape index: {}]   ;;  %s1586_s5 = inlined_call_operand.hbm [shape: f32[16,128], index: 5, kind: output, shape index: {}]  }
   0x1   :  { %11 = vsyncpa [#allocation7], 0  ;;  %s30_s20 = sshll.u32 %s1582_s1, 4  ;;  %s31_s20 = int_to_ptr.hbm [resolvable:$true] %s30_s20 }
   0x2   :  { %12 = vsyncpa [#allocation5], 0  ;;  %s1452_s21 = smov [#allocation6]   ;;  %s17_s25 = sshll.u32 %s1581_s0, 4  ;;  %s18_s25 = int_to_ptr.hbm [resolvable:$true] %s17_s25 }
   0x3   :  { %s32_s22 = sshll.u32 %s1452_s21, 4  ;;  %s1453_s26 = smov 256   ;;  %s33_s22 = int_to_ptr.vmem [resolvable:$true] %s32_s22 }
   0x4   :  { %s1454_s27 = smov 16   ;;  %s1455_s28 = smov [#allocation3]  }
   0x5   :  { %38 = dma.hbm_to_vmem [thread:$0]  %s31_s20, 4096, %s33_s22, [#allocation7], %s1453_s26, %s1453_s26, %s1454_s27  }
   0x6   :  { %s19_s29 = sshll.u32 %s1455_s28, 4  ;;  %s1456_s30 = smov 128   ;;  %s20_s29 = int_to_ptr.vmem [resolvable:$true] %s19_s29 }
   0x7   :  { %s1457_s6 = smov 8   ;;  %s45_s8 = sshll.u32 %s1584_s3, 4  ;;  %s46_s8 = int_to_ptr.hbm [resolvable:$true] %s45_s8 }
   0x8   :  { %25 = dma.hbm_to_vmem [thread:$0]  %s18_s25, 256, %s20_s29, [#allocation4], %s1456_s30, %s1456_s30, %s1457_s6  }
   0x9   :  { %s1458_s9 = smov [#allocation8]   ;;  %s1459_s10 = smov 64  }
   0xa   :  { %s47_s0 = sshll.u32 %s1458_s9, 4  ;;  %s1460_s11 = smov 4   ;;  %s48_s0 = int_to_ptr.vmem [resolvable:$true] %s47_s0 }
   0xb   :  { %53 = dma.hbm_to_vmem [thread:$0]  %s46_s8, 4096, %s48_s0, [#allocation7], %s1459_s10, %s1459_s10, %s1460_s11  }
   0xc   :  { %1446 = dma.done.wait [#allocation4], 256  }
   0xd   :  { %1447 = vsyncadd [#allocation4], 4294967040 }
   0xe   :  { %1448 = dma.done.wait [#allocation7], 8192  }
   0xf   :  { %1449 = vsyncadd [#allocation7], 4294959104  ;;  %v1026_v0 = vld [vmem:[#allocation6 + $0xe0] sm:$0xf]  ;;  %v1262_v1 = vld [vmem:[#allocation6 + $0xec] sm:$0xf0] }
  0x10   :  { %v1091_v2 = vld [vmem:[#allocation6 + $0xe4] sm:$0xf]  ;;  %v1027_v3 = vor.u32 %v1262_v1, %v1026_v0  ;;  %v1278_v4 = vld [vmem:[#allocation6 + $0xf0] sm:$0xf0]  ;;  %v1022_v5 = vld [vmem:[#allocation6 + $0xc0] sm:$0xf] }
  0x11   :  { %v1261_v6 = vld [vmem:[#allocation6 + $0xcc] sm:$0xf0]  ;;  %v1092_v7 = vor.u32 %v1278_v4, %v1091_v2  ;;  %v1087_v8 = vld [vmem:[#allocation6 + $0xc4] sm:$0xf]  ;;  %v1277_v9 = vld [vmem:[#allocation6 + $0xd0] sm:$0xf0] }
  0x12   :  { %141 = vmatpush.bf16.msra.mxu0 %v1027_v3  ;;  %v1023_v10 = vor.u32 %v1261_v6, %v1022_v5  ;;  %v1088_v11 = vor.u32 %v1277_v9, %v1087_v8  ;;  %v1018_v12 = vld [vmem:[#allocation6 + $0xa0] sm:$0xf]  ;;  %v1260_v13 = vld [vmem:[#allocation6 + $0xac] sm:$0xf0]  ;;  %v1083_v14 = vld [vmem:[#allocation6 + $0xa4] sm:$0xf] }
  0x13   :  { %364 = vmatpush.bf16.msra.mxu2 %v1092_v7  ;;  %v1276_v15 = vld [vmem:[#allocation6 + $0xb0] sm:$0xf0]  ;;  %v1019_v16 = vor.u32 %v1260_v13, %v1018_v12  ;;  %v1014_v18 = vld [vmem:[#allocation6 + $0x80] sm:$0xf]  ;;  %v1259_v19 = vld [vmem:[#allocation6 + $0x8c] sm:$0xf0] }
  0x14   :  { %v1084_v17 = vor.u32 %v1276_v15, %v1083_v14  ;;  %v1079_v20 = vld [vmem:[#allocation6 + $0x84] sm:$0xf]  ;;  %v1275_v21 = vld [vmem:[#allocation6 + $0x90] sm:$0xf0]  ;;  %v1015_v22 = vor.u32 %v1259_v19, %v1014_v18  ;;  %v1010_v24 = vld [vmem:[#allocation6 + $0x60] sm:$0xf] }
  0x15   :  { %v1080_v23 = vor.u32 %v1275_v21, %v1079_v20  ;;  %v1258_v25 = vld [vmem:[#allocation6 + $0x6c] sm:$0xf0]  ;;  %v1075_v26 = vld [vmem:[#allocation6 + $0x64] sm:$0xf]  ;;  %v1274_v27 = vld [vmem:[#allocation6 + $0x70] sm:$0xf0] }
  0x16   :  { %142 = vmatpush.bf16.msra.mxu0 %v1023_v10  ;;  %v1011_v28 = vor.u32 %v1258_v25, %v1010_v24  ;;  %v1076_v29 = vor.u32 %v1274_v27, %v1075_v26  ;;  %v1006_v30 = vld [vmem:[#allocation6 + $0x40] sm:$0xf]  ;;  %v1257_v31 = vld [vmem:[#allocation6 + $0x4c] sm:$0xf0]  ;;  %v1071_v32 = vld [vmem:[#allocation6 + $0x44] sm:$0xf] }
  0x17   :  { %365 = vmatpush.bf16.msra.mxu2 %v1088_v11  ;;  %v1273_v33 = vld [vmem:[#allocation6 + $0x50] sm:$0xf0]  ;;  %v1002_v34 = vld [vmem:[#allocation6 + $0x20] sm:$0xf]  ;;  %v1007_v35 = vor.u32 %v1257_v31, %v1006_v30  ;;  %v1256_v36 = vld [vmem:[#allocation6 + $0x2c] sm:$0xf0] }
  0x18   :  { %v1072_v37 = vor.u32 %v1273_v33, %v1071_v32  ;;  %v1067_v38 = vld [vmem:[#allocation6 + $0x24] sm:$0xf]  ;;  %v1272_v39 = vld [vmem:[#allocation6 + $0x30] sm:$0xf0]  ;;  %v1003_v40 = vor.u32 %v1256_v36, %v1002_v34  ;;  %v998_v42 = vld [vmem:[#allocation6] sm:$0xf] }
  0x19   :  { %v1068_v41 = vor.u32 %v1272_v39, %v1067_v38  ;;  %v1255_v43 = vld [vmem:[#allocation6 + $0xc] sm:$0xf0]  ;;  %v1063_v44 = vld [vmem:[#allocation6 + $0x4] sm:$0xf]  ;;  %v1271_v45 = vld [vmem:[#allocation6 + $0x10] sm:$0xf0] }
  0x1a   :  { %143 = vmatpush.bf16.msra.mxu0 %v1019_v16  ;;  %v1156_v46 = vld [vmem:[#allocation6 + $0xe8] sm:$0xf]  ;;  %v1294_v47 = vld [vmem:[#allocation6 + $0xf4] sm:$0xf0]  ;;  %v1221_v48 = vld [vmem:[#allocation6 + $0xec] sm:$0xf]  ;;  %v999_v50 = vor.u32 %v1255_v43, %v998_v42  ;;  %v1064_v53 = vor.u32 %v1271_v45, %v1063_v44 }
  0x1b   :  { %366 = vmatpush.bf16.msra.mxu2 %v1084_v17  ;;  %v1310_v49 = vld [vmem:[#allocation6 + $0xf8] sm:$0xf0]  ;;  %v68_v51 = vld [vmem:[#allocation3] sm:$0xff]  ;;  %v1157_v54 = vor.u32 %v1294_v47, %v1156_v46  ;;  %v1152_v56 = vld [vmem:[#allocation6 + $0xc8] sm:$0xf]  ;;  %s1461_s20 = smov [#allocation9]  }
  0x1c   :  { %v69_v52 = vld [vmem:[#allocation3 + $0x8] sm:$0xff]  ;;  %v1222_v55 = vor.u32 %v1310_v49, %v1221_v48  ;;  %v1217_v59 = vld [vmem:[#allocation6 + $0xcc] sm:$0xf]  ;;  %v1148_v63 = vld [vmem:[#allocation6 + $0xa8] sm:$0xf]  ;;  %s980_s21 = sshll.u32 %s1461_s20, 4  ;;  %s981_s21 = int_to_ptr.vmem [resolvable:$true] %s980_s21 }
  0x1d   :  { %v1293_v57 = vld [vmem:[#allocation6 + $0xd4] sm:$0xf0]  ;;  %v70_v58 = vpack.c.bf16 %v69_v52, %v68_v51  ;;  %v1309_v60 = vld [vmem:[#allocation6 + $0xd8] sm:$0xf0]  ;;  %v1213_v1 = vld [vmem:[#allocation6 + $0xac] sm:$0xf] }
  0x1e   :  { %144 = vmatpush.bf16.msra.mxu0 %v1015_v22  ;;  %v1153_v61 = vor.u32 %v1293_v57, %v1152_v56  ;;  %v1218_v62 = vor.u32 %v1309_v60, %v1217_v59  ;;  %v1292_v0 = vld [vmem:[#allocation6 + $0xb4] sm:$0xf0]  ;;  %v1308_v2 = vld [vmem:[#allocation6 + $0xb8] sm:$0xf0]  ;;  %v1144_v5 = vld [vmem:[#allocation6 + $0x88] sm:$0xf] }
  0x1f   :  { %367 = vmatpush.bf16.msra.mxu2 %v1080_v23  ;;  %v1149_v3 = vor.u32 %v1292_v0, %v1148_v63  ;;  %v1214_v4 = vor.u32 %v1308_v2, %v1213_v1  ;;  %v1291_v6 = vld [vmem:[#allocation6 + $0x94] sm:$0xf0]  ;;  %v1209_v7 = vld [vmem:[#allocation6 + $0x8c] sm:$0xf]  ;;  %v1307_v8 = vld [vmem:[#allocation6 + $0x98] sm:$0xf0] }
  0x20   :  { %v1145_v9 = vor.u32 %v1291_v6, %v1144_v5  ;;  %v1210_v10 = vor.u32 %v1307_v8, %v1209_v7  ;;  %v1140_v11 = vld [vmem:[#allocation6 + $0x68] sm:$0xf]  ;;  %v1290_v12 = vld [vmem:[#allocation6 + $0x74] sm:$0xf0]  ;;  %v1205_v13 = vld [vmem:[#allocation6 + $0x6c] sm:$0xf] }
  0x21   :  { %v1306_v14 = vld [vmem:[#allocation6 + $0x78] sm:$0xf0]  ;;  %v1141_v15 = vor.u32 %v1290_v12, %v1140_v11  ;;  %v1136_v17 = vld [vmem:[#allocation6 + $0x48] sm:$0xf]  ;;  %v1289_v18 = vld [vmem:[#allocation6 + $0x54] sm:$0xf0] }
  0x22   :  { %145 = vmatpush.bf16.msra.mxu0 %v1011_v28  ;;  %v1206_v16 = vor.u32 %v1306_v14, %v1205_v13  ;;  %v1201_v19 = vld [vmem:[#allocation6 + $0x4c] sm:$0xf]  ;;  %v1305_v20 = vld [vmem:[#allocation6 + $0x58] sm:$0xf0]  ;;  %v1137_v21 = vor.u32 %v1289_v18, %v1136_v17  ;;  %v1132_v23 = vld [vmem:[#allocation6 + $0x28] sm:$0xf] }
  0x23   :  { %368 = vmatpush.bf16.msra.mxu2 %v1076_v29  ;;  %v1202_v22 = vor.u32 %v1305_v20, %v1201_v19  ;;  %v1288_v24 = vld [vmem:[#allocation6 + $0x34] sm:$0xf0]  ;;  %v1197_v25 = vld [vmem:[#allocation6 + $0x2c] sm:$0xf]  ;;  %v1304_v26 = vld [vmem:[#allocation6 + $0x38] sm:$0xf0] }
  0x24   :  { %v1133_v27 = vor.u32 %v1288_v24, %v1132_v23  ;;  %v1198_v28 = vor.u32 %v1304_v26, %v1197_v25  ;;  %v1128_v29 = vld [vmem:[#allocation6 + $0x8] sm:$0xf]  ;;  %v1287_v30 = vld [vmem:[#allocation6 + $0x14] sm:$0xf0]  ;;  %v1193_v31 = vld [vmem:[#allocation6 + $0xc] sm:$0xf] }
  0x25   :  { %v1303_v32 = vld [vmem:[#allocation6 + $0x18] sm:$0xf0]  ;;  %v1129_v33 = vor.u32 %v1287_v30, %v1128_v29  ;;  %v1269_v42 = vld [vmem:[#allocation8 + $0x30] sm:$0xff]  ;;  %v1268_v51 = vld [vmem:[#allocation8 + $0x28] sm:$0xff]  ;;  %s982_s24 = sshll.u32 %s1586_s5, 4  ;;  %s983_s24 = int_to_ptr.hbm [resolvable:$true] %s982_s24 }
  0x26   :  { %146 = vmatpush.bf16.msra.mxu0 %v1007_v35  ;;  %v1194_v34 = vor.u32 %v1303_v32, %v1193_v31  ;;  %v1329_v35 = vld [vmem:[%s1583_s2] ss:$0 sm:$0xff]  ;;  %v1270_v38 = vld [vmem:[#allocation8 + $0x38] sm:$0xff]  ;;  %v1267_v59 = vld [vmem:[#allocation8 + $0x20] sm:$0xff] }
  0x27   :  { %369 = vmatpush.bf16.msra.mxu2 %v1072_v37  ;;  %276 = vmatpush.bf16.msra.mxu1 %v1270_v38  ;;  %v1286_v47 = vld [vmem:[#allocation8 + $0x78] sm:$0xff]  ;;  %v1284_v1 = vld [vmem:[#allocation8 + $0x68] sm:$0xff]  ;;  %v1283_v11 = vld [vmem:[#allocation8 + $0x60] sm:$0xff] }
  0x28   :  { %500 = vmatpush.bf16.msra.mxu3 %v1286_v47  ;;  %v1266_v6 = vld [vmem:[#allocation8 + $0x18] sm:$0xff]  ;;  %v1331_v26 = vld [vmem:[%s1583_s2 + $0x2] ss:$0 sm:$0xff]  ;;  %v1280_v47 = vld [vmem:[#allocation8 + $0x48] sm:$0xff] }
  0x29   :  { %v1281_v32 = vld [vmem:[#allocation8 + $0x50] sm:$0xff] }
  0x2a   :  { %147 = vmatpush.bf16.msra.mxu0 %v1003_v40  ;;  %v1330_v40 = vld [vmem:[%s1583_s2 + $0x1] ss:$0 sm:$0xff] }
  0x2b   :  { %370 = vmatpush.bf16.msra.mxu2 %v1068_v41  ;;  %277 = vmatpush.bf16.msra.mxu1 %v1269_v42  ;;  %v1302_v42 = vld [vmem:[#allocation8 + $0xb8] sm:$0xff] }
  0x2e   :  { %148 = vmatpush.bf16.msra.mxu0 %v999_v50 }
  0x2f   :  { %371 = vmatpush.bf16.msra.mxu2 %v1064_v53  ;;  %278 = vmatpush.bf16.msra.mxu1 %v1268_v51 }
  0x31   :  { %149 = vmatmul.bf16.vlgmr.msra.gmra.mxu0 %v70_v58 }
  0x32   :  { %588 = vmatpush.bf16.msrb.mxu0 %v1157_v54  ;;  %372 = vmatmul.bf16.vlgmr.msra.gmra.mxu2 %v70_v58 }
  0x33   :  { %812 = vmatpush.bf16.msrb.mxu2 %v1222_v55  ;;  %v1285_v55 = vld [vmem:[#allocation8 + $0x70] sm:$0xff]  ;;  %279 = vmatpush.bf16.msra.mxu1 %v1267_v59 }
  0x34   :  { %501 = vmatpush.bf16.msra.mxu3 %v1285_v55 }
  0x36   :  { %589 = vmatpush.bf16.msrb.mxu0 %v1153_v61 }
  0x37   :  { %813 = vmatpush.bf16.msrb.mxu2 %v1218_v62  ;;  %280 = vmatpush.bf16.msra.mxu1 %v1266_v6 }
  0x38   :  { %502 = vmatpush.bf16.msra.mxu3 %v1284_v1 }
  0x3a   :  { %590 = vmatpush.bf16.msrb.mxu0 %v1149_v3 }
  0x3b   :  { %814 = vmatpush.bf16.msrb.mxu2 %v1214_v4 }
  0x3c   :  { %503 = vmatpush.bf16.msra.mxu3 %v1283_v11 }
  0x3e   :  { %591 = vmatpush.bf16.msrb.mxu0 %v1145_v9 }
  0x3f   :  { %815 = vmatpush.bf16.msrb.mxu2 %v1210_v10 }
  0x42   :  { %592 = vmatpush.bf16.msrb.mxu0 %v1141_v15 }
  0x43   :  { %816 = vmatpush.bf16.msrb.mxu2 %v1206_v16  ;;  %v1265_v16 = vld [vmem:[#allocation8 + $0x10] sm:$0xff] }
  0x44   :  { %281 = vmatpush.bf16.msra.mxu1 %v1265_v16 }
  0x46   :  { %593 = vmatpush.bf16.msrb.mxu0 %v1137_v21  ;;  %v1282_v21 = vld [vmem:[#allocation8 + $0x58] sm:$0xff] }
  0x47   :  { %817 = vmatpush.bf16.msrb.mxu2 %v1202_v22  ;;  %504 = vmatpush.bf16.msra.mxu3 %v1282_v21 }
  0x4a   :  { %594 = vmatpush.bf16.msrb.mxu0 %v1133_v27  ;;  %v1264_v27 = vld [vmem:[#allocation8 + $0x8] sm:$0xff] }
  0x4b   :  { %818 = vmatpush.bf16.msrb.mxu2 %v1198_v28  ;;  %282 = vmatpush.bf16.msra.mxu1 %v1264_v27 }
  0x4c   :  { %505 = vmatpush.bf16.msra.mxu3 %v1281_v32  ;;  %v1317_v32 = vld [vmem:[#allocation8 + $0xf0] sm:$0xff] }
  0x4e   :  { %595 = vmatpush.bf16.msrb.mxu0 %v1129_v33 }
  0x4f   :  { %819 = vmatpush.bf16.msrb.mxu2 %v1194_v34 }
  0x50   :  { %506 = vmatpush.bf16.msra.mxu3 %v1280_v47 }
  0x51   :  { %596 = vmatmul.bf16.vlgmr.msrb.gmra.mxu0 %v70_v58 }
  0x52   :  { %820 = vmatmul.bf16.vlgmr.msrb.gmra.mxu2 %v70_v58 }
  0xae   :  { %v150_v36 = vpop.f32.mrf.mxu0 }
  0xaf   :  { %v151_v37 = vadd.f32 %v1329_v35, %v150_v36 }
  0xb1   :  { %v155_v39 = vpack.c.bf16 %v151_v37, %v151_v37 }
  0xb3   :  { %v1510_v41 = vunpack.c.l.bf16 %v155_v39  ;;  %v1263_v39 = vld [vmem:[#allocation8] sm:$0xff] }
  0xb4   :  { %283 = vmatpush.bf16.msra.mxu1 %v1263_v39 }
  0xb5   :  { %v163_v43 = vmul.f32 %v1510_v41, %v1510_v41  ;;  %v373_v44 = vpop.f32.mrf.mxu2  ;;  %v159_v39 = vmul.f32 0.5, %v1510_v41 }
  0xb6   :  { %v374_v45 = vadd.f32 %v1330_v40, %v373_v44  ;;  %v152_v46 = vpop.f32.mrf.mxu0 }
  0xb7   :  { %v165_v48 = vpack.c.bf16 %v163_v43, %v163_v43  ;;  %v153_v49 = vadd.f32 %v1329_v35, %v152_v46 }
  0xb8   :  { %v378_v50 = vpack.c.bf16 %v374_v45, %v374_v45  ;;  %724 = vmatpush.bf16.msrb.mxu1 %v1302_v42  ;;  %v1316_v42 = vld [vmem:[#allocation8 + $0xe8] sm:$0xff] }
  0xb9   :  { %v167_v52 = vunpack.c.l.bf16 %v165_v48  ;;  %v156_v53 = vpack.c.bf16 %v153_v49, %v153_v49  ;;  %v1332_v49 = vld [vmem:[%s1583_s2 + $0x3] ss:$0 sm:$0xff] }
  0xba   :  { %v1514_v54 = vunpack.c.l.bf16 %v378_v50 }
  0xbb   :  { %v169_v56 = vmul.f32 %v167_v52, %v1510_v41  ;;  %v1517_v57 = vunpack.c.l.bf16 %v156_v53 }
  0xbc   :  { %v386_v58 = vmul.f32 %v1514_v54, %v1514_v54 }
  0xbd   :  { %v171_v60 = vpack.c.bf16 %v169_v56, %v169_v56  ;;  %v164_v61 = vmul.f32 %v1517_v57, %v1517_v57  ;;  %v375_v62 = vpop.f32.mrf.mxu2 }
  0xbe   :  { %v388_v63 = vpack.c.bf16 %v386_v58, %v386_v58  ;;  %v376_v0 = vadd.f32 %v1330_v40, %v375_v62  ;;  %v1301_v58 = vld [vmem:[#allocation8 + $0xb0] sm:$0xff] }
  0xbf   :  { %v173_v2 = vunpack.c.l.bf16 %v171_v60  ;;  %v166_v3 = vpack.c.bf16 %v164_v61, %v164_v61  ;;  %725 = vmatpush.bf16.msrb.mxu1 %v1301_v58 }
  0xc0   :  { %v390_v4 = vunpack.c.l.bf16 %v388_v63  ;;  %v379_v5 = vpack.c.bf16 %v376_v0, %v376_v0  ;;  %v1279_v63 = vld [vmem:[#allocation8 + $0x40] sm:$0xff] }
  0xc1   :  { %v175_v7 = vmul.f32 0.044677734, %v173_v2  ;;  %v168_v8 = vunpack.c.l.bf16 %v166_v3  ;;  %v1318_v3 = vld [vmem:[#allocation8 + $0xf8] sm:$0xff]  ;;  %507 = vmatpush.bf16.msra.mxu3 %v1279_v63 }
  0xc2   :  { %v392_v9 = vmul.f32 %v390_v4, %v1514_v54  ;;  %v1524_v10 = vunpack.c.l.bf16 %v379_v5 }
  0xc3   :  { %v177_v12 = vpack.c.bf16 %v175_v7, %v175_v7  ;;  %v170_v13 = vmul.f32 %v168_v8, %v1517_v57 }
  0xc4   :  { %v394_v14 = vpack.c.bf16 %v392_v9, %v392_v9  ;;  %v387_v15 = vmul.f32 %v1524_v10, %v1524_v10 }
  0xc5   :  { %v179_v17 = vunpack.c.l.bf16 %v177_v12  ;;  %v172_v18 = vpack.c.bf16 %v170_v13, %v170_v13  ;;  %948 = vmatpush.bf16.msrb.mxu3 %v1318_v3 }
  0xc6   :  { %v396_v19 = vunpack.c.l.bf16 %v394_v14  ;;  %v389_v20 = vpack.c.bf16 %v387_v15, %v387_v15 }
  0xc7   :  { %v181_v22 = vadd.f32 %v179_v17, %v1510_v41  ;;  %v174_v23 = vunpack.c.l.bf16 %v172_v18 }
  0xc8   :  { %v398_v24 = vmul.f32 0.044677734, %v396_v19  ;;  %v391_v25 = vunpack.c.l.bf16 %v389_v20 }
  0xc9   :  { %v183_v28 = vpack.c.bf16 %v181_v22, %v181_v22  ;;  %v176_v29 = vmul.f32 0.044677734, %v174_v23  ;;  %949 = vmatpush.bf16.msrb.mxu3 %v1317_v32  ;;  %v383_v32 = vmul.f32 0.5, %v1524_v10 }
  0xca   :  { %v400_v30 = vpack.c.bf16 %v398_v24, %v398_v24  ;;  %v393_v31 = vmul.f32 %v391_v25, %v1524_v10  ;;  %v1300_v24 = vld [vmem:[#allocation8 + $0xa8] sm:$0xff] }
  0xcb   :  { %v185_v33 = vunpack.c.l.bf16 %v183_v28  ;;  %v178_v34 = vpack.c.bf16 %v176_v29, %v176_v29  ;;  %726 = vmatpush.bf16.msrb.mxu1 %v1300_v24  ;;  %v1296_v24 = vld [vmem:[#allocation8 + $0x88] sm:$0xff] }
  0xcc   :  { %v402_v36 = vunpack.c.l.bf16 %v400_v30  ;;  %v395_v37 = vpack.c.bf16 %v393_v31, %v393_v31 }
  0xcd   :  { %v180_v40 = vunpack.c.l.bf16 %v178_v34  ;;  %v187_v43 = vmul.f32 0.796875, %v185_v33  ;;  %950 = vmatpush.bf16.msrb.mxu3 %v1316_v42 }
  0xce   :  { %v597_v35 = vpop.f32.mrf.mxu0  ;;  %v404_v44 = vadd.f32 %v402_v36, %v1514_v54  ;;  %v397_v45 = vunpack.c.l.bf16 %v395_v37 }
  0xcf   :  { %v598_v38 = vadd.f32 %v1331_v26, %v597_v35  ;;  %v182_v48 = vadd.f32 %v180_v40, %v1517_v57  ;;  %v189_v50 = vpack.c.bf16 %v187_v43, %v187_v43  ;;  %v1299_v40 = vld [vmem:[#allocation8 + $0xa0] sm:$0xff] }
  0xd0   :  { %v406_v51 = vpack.c.bf16 %v404_v44, %v404_v44  ;;  %v399_v52 = vmul.f32 0.044677734, %v397_v45  ;;  %727 = vmatpush.bf16.msrb.mxu1 %v1299_v40 }
  0xd1   :  { %v602_v46 = vpack.c.bf16 %v598_v38, %v598_v38  ;;  %v184_v55 = vpack.c.bf16 %v182_v48, %v182_v48  ;;  %v191_v56 = vunpack.c.l.bf16 %v189_v50 }
  0xd2   :  { %v408_v59 = vunpack.c.l.bf16 %v406_v51  ;;  %v401_v60 = vpack.c.bf16 %v399_v52, %v399_v52  ;;  %v160_v52 = vmul.f32 0.5, %v1517_v57 }
  0xd3   :  { %v1539_v53 = vunpack.c.l.bf16 %v602_v46  ;;  %v186_v0 = vunpack.c.l.bf16 %v184_v55  ;;  %1334 = vtanh.f32 %v191_v56 }
  0xd4   :  { %v403_v4 = vunpack.c.l.bf16 %v401_v60  ;;  %v410_v7 = vmul.f32 0.796875, %v408_v59  ;;  %v161_v59 = vpack.c.bf16 %v159_v39, %v159_v39  ;;  %v1315_v60 = vld [vmem:[#allocation8 + $0xe0] sm:$0xff] }
  0xd5   :  { %v610_v61 = vmul.f32 %v1539_v53, %v1539_v53  ;;  %v821_v62 = vpop.f32.mrf.mxu2  ;;  %v188_v9 = vmul.f32 0.796875, %v186_v0  ;;  %951 = vmatpush.bf16.msrb.mxu3 %v1315_v60 }
  0xd6   :  { %v822_v1 = vadd.f32 %v1332_v49, %v821_v62  ;;  %v599_v2 = vpop.f32.mrf.mxu0  ;;  %v405_v11 = vadd.f32 %v403_v4, %v1524_v10  ;;  %v412_v14 = vpack.c.bf16 %v410_v7, %v410_v7  ;;  %v1297_v4 = vld [vmem:[#allocation8 + $0x90] sm:$0xff] }
  0xd7   :  { %v612_v5 = vpack.c.bf16 %v610_v61, %v610_v61  ;;  %v600_v6 = vadd.f32 %v1331_v26, %v599_v2  ;;  %v190_v16 = vpack.c.bf16 %v188_v9, %v188_v9 }
  0xd8   :  { %v826_v8 = vpack.c.bf16 %v822_v1, %v822_v1  ;;  %v407_v17 = vpack.c.bf16 %v405_v11, %v405_v11  ;;  %v414_v23 = vunpack.c.l.bf16 %v412_v14  ;;  %v203_v11 = vunpack.c.l.bf16 %v161_v59 }
  0xd9   :  { %v614_v12 = vunpack.c.l.bf16 %v612_v5  ;;  %v603_v13 = vpack.c.bf16 %v600_v6, %v600_v6  ;;  %v1335_v20 = vpop.eup %1334  ;;  %v192_v22 = vunpack.c.l.bf16 %v190_v16  ;;  %v162_v6 = vpack.c.bf16 %v160_v52, %v160_v52  ;;  %v1312_v52 = vld [vmem:[#allocation8 + $0xc8] sm:$0xff] }
  0xda   :  { %v1544_v15 = vunpack.c.l.bf16 %v826_v8  ;;  %v409_v25 = vunpack.c.l.bf16 %v407_v17  ;;  %v195_v29 = vpack.c.bf16 %v1335_v20, %v1335_v20 }
  0xdb   :  { %v616_v18 = vmul.f32 %v614_v12, %v1539_v53  ;;  %v1547_v19 = vunpack.c.l.bf16 %v603_v13  ;;  %1336 = vtanh.f32 %v192_v22  ;;  %v1314_v13 = vld [vmem:[#allocation8 + $0xd8] sm:$0xff] }
  0xdc   :  { %v834_v21 = vmul.f32 %v1544_v15, %v1544_v15  ;;  %v197_v35 = vunpack.c.l.bf16 %v195_v29  ;;  %v411_v36 = vmul.f32 0.796875, %v409_v25  ;;  %1338 = vtanh.f32 %v414_v23  ;;  %952 = vmatpush.bf16.msrb.mxu3 %v1314_v13 }
  0xdd   :  { %v618_v26 = vpack.c.bf16 %v616_v18, %v616_v18  ;;  %v611_v27 = vmul.f32 %v1547_v19, %v1547_v19  ;;  %v823_v28 = vpop.f32.mrf.mxu2  ;;  %v382_v18 = vmul.f32 0.5, %v1514_v54 }
  0xde   :  { %v836_v30 = vpack.c.bf16 %v834_v21, %v834_v21  ;;  %v824_v31 = vadd.f32 %v1332_v49, %v823_v28  ;;  %v413_v45 = vpack.c.bf16 %v411_v36, %v411_v36  ;;  %v199_v48 = vadd.f32 1.0, %v197_v35  ;;  %v1298_v49 = vld [vmem:[#allocation8 + $0x98] sm:$0xff] }
  0xdf   :  { %v620_v33 = vunpack.c.l.bf16 %v618_v26  ;;  %v613_v34 = vpack.c.bf16 %v611_v27, %v611_v27  ;;  %728 = vmatpush.bf16.msrb.mxu1 %v1298_v49  ;;  %v204_v28 = vunpack.c.l.bf16 %v162_v6 }
  0xe0   :  { %v838_v37 = vunpack.c.l.bf16 %v836_v30  ;;  %v827_v38 = vpack.c.bf16 %v824_v31, %v824_v31  ;;  %v415_v41 = vunpack.c.l.bf16 %v413_v45  ;;  %v201_v3 = vpack.c.bf16 %v199_v48, %v199_v48 }
  0xe1   :  { %v622_v43 = vmul.f32 0.044677734, %v620_v33  ;;  %v615_v44 = vunpack.c.l.bf16 %v613_v34  ;;  %v1337_v55 = vpop.eup %1336  ;;  %v1313_v34 = vld [vmem:[#allocation8 + $0xd0] sm:$0xff] }
  0xe2   :  { %v840_v46 = vmul.f32 %v838_v37, %v1544_v15  ;;  %v1555_v47 = vunpack.c.l.bf16 %v827_v38  ;;  %v196_v63 = vpack.c.bf16 %v1337_v55, %v1337_v55  ;;  %v1339_v0 = vpop.eup %1338  ;;  %1340 = vtanh.f32 %v415_v41  ;;  %953 = vmatpush.bf16.msrb.mxu3 %v1313_v34 }
  0xe3   :  { %v624_v50 = vpack.c.bf16 %v622_v43, %v622_v43  ;;  %v617_v51 = vmul.f32 %v615_v44, %v1547_v19  ;;  %v418_v12 = vpack.c.bf16 %v1339_v0, %v1339_v0  ;;  %v205_v22 = vunpack.c.l.bf16 %v201_v3  ;;  %729 = vmatpush.bf16.msrb.mxu1 %v1297_v4  ;;  %v1295_v43 = vld [vmem:[#allocation8 + $0x80] sm:$0xff] }
  0xe4   :  { %v842_v56 = vpack.c.bf16 %v840_v46, %v840_v46  ;;  %v835_v58 = vmul.f32 %v1555_v47, %v1555_v47  ;;  %v198_v7 = vunpack.c.l.bf16 %v196_v63 }
  0xe5   :  { %v626_v61 = vunpack.c.l.bf16 %v624_v50  ;;  %v619_v62 = vpack.c.bf16 %v617_v51, %v617_v51  ;;  %v420_v23 = vunpack.c.l.bf16 %v418_v12  ;;  %v207_v40 = vmul.f32 %v205_v22, %v203_v11 }
  0xe6   :  { %v844_v1 = vunpack.c.l.bf16 %v842_v56  ;;  %v837_v2 = vpack.c.bf16 %v835_v58, %v835_v58  ;;  %v200_v17 = vadd.f32 1.0, %v198_v7  ;;  %v384_v50 = vpack.c.bf16 %v382_v18, %v382_v18  ;;  %954 = vmatpush.bf16.msrb.mxu3 %v1312_v52 }
  0xe7   :  { %v628_v57 = vadd.f32 %v626_v61, %v1539_v53  ;;  %v621_v5 = vunpack.c.l.bf16 %v619_v62  ;;  %v422_v33 = vadd.f32 1.0, %v420_v23  ;;  %730 = vmatpush.bf16.msrb.mxu1 %v1296_v24  ;;  %v385_v51 = vpack.c.bf16 %v383_v32, %v383_v32 }
  0xe8   :  { %v846_v8 = vmul.f32 0.044677734, %v844_v1  ;;  %v839_v9 = vunpack.c.l.bf16 %v837_v2  ;;  %v202_v27 = vpack.c.bf16 %v200_v17, %v200_v17  ;;  %v1341_v29 = vpop.eup %1340  ;;  %v1311_v2 = vld [vmem:[#allocation8 + $0xc0] sm:$0xff]  ;;  %v426_v4 = vunpack.c.l.bf16 %v384_v50 }
  0xe9   :  { %v630_v14 = vpack.c.bf16 %v628_v57, %v628_v57  ;;  %v623_v16 = vmul.f32 0.044677734, %v621_v5  ;;  %v419_v37 = vpack.c.bf16 %v1341_v29, %v1341_v29  ;;  %v424_v42 = vpack.c.bf16 %v422_v33, %v422_v33 }
  0xea   :  { %v848_v20 = vpack.c.bf16 %v846_v8, %v846_v8  ;;  %v841_v21 = vmul.f32 %v839_v9, %v1555_v47  ;;  %v206_v36 = vunpack.c.l.bf16 %v202_v27  ;;  %v427_v57 = vunpack.c.l.bf16 %v385_v51  ;;  %955 = vmatpush.bf16.msrb.mxu3 %v1311_v2 }
  0xeb   :  { %v632_v25 = vunpack.c.l.bf16 %v630_v14  ;;  %v625_v26 = vpack.c.bf16 %v623_v16, %v623_v16  ;;  %v421_v48 = vunpack.c.l.bf16 %v419_v37  ;;  %731 = vmatpush.bf16.msrb.mxu1 %v1295_v43  ;;  %v428_v63 = vunpack.c.l.bf16 %v424_v42 }
  0xec   :  { %v850_v30 = vunpack.c.l.bf16 %v848_v20  ;;  %v843_v31 = vpack.c.bf16 %v841_v21, %v841_v21  ;;  %v208_v46 = vmul.f32 %v206_v36, %v204_v28  ;;  %v606_v29 = vmul.f32 0.5, %v1539_v53 }
  0xed   :  { %v634_v54 = vmul.f32 0.796875, %v632_v25  ;;  %v627_v35 = vunpack.c.l.bf16 %v625_v26  ;;  %v423_v58 = vadd.f32 1.0, %v421_v48  ;;  %v430_v9 = vmul.f32 %v428_v63, %v426_v4 }
  0xee   :  { %v852_v38 = vadd.f32 %v850_v30, %v1544_v15  ;;  %v845_v39 = vunpack.c.l.bf16 %v843_v31  ;;  %v209_v56 = vpack.c.bf16 %v208_v46, %v207_v40  ;;  %v607_v30 = vmul.f32 0.5, %v1547_v19 }
  0xef   :  { %v636_v44 = vpack.c.bf16 %v634_v54, %v634_v54  ;;  %v629_v45 = vadd.f32 %v627_v35, %v1547_v19  ;;  %v425_v62 = vpack.c.bf16 %v423_v58, %v423_v58  ;;  %v608_v54 = vpack.c.bf16 %v606_v29, %v606_v29 }
  0xf0   :  { %v854_v10 = vpack.c.bf16 %v852_v38, %v852_v38  ;;  %v847_v49 = vmul.f32 0.044677734, %v845_v39  ;;  %284 = vmatmul.bf16.vlgmr.msra.gmra.mxu1 %v209_v56  ;;  %v609_v35 = vpack.c.bf16 %v607_v30, %v607_v30  ;;  %v830_v42 = vmul.f32 0.5, %v1544_v15 }
  0xf1   :  { %v638_v41 = vunpack.c.l.bf16 %v636_v44  ;;  %v631_v55 = vpack.c.bf16 %v629_v45, %v629_v45  ;;  %v429_v5 = vunpack.c.l.bf16 %v425_v62  ;;  %v831_v43 = vmul.f32 0.5, %v1555_v47 }
  0xf2   :  { %v856_v59 = vunpack.c.l.bf16 %v854_v10  ;;  %v849_v60 = vpack.c.bf16 %v847_v49, %v847_v49  ;;  %v650_v53 = vunpack.c.l.bf16 %v608_v54  ;;  %v651_v45 = vunpack.c.l.bf16 %v609_v35 }
  0xf3   :  { %v633_v61 = vunpack.c.l.bf16 %v631_v55  ;;  %1342 = vtanh.f32 %v638_v41  ;;  %v431_v11 = vmul.f32 %v429_v5, %v427_v57  ;;  %v832_v50 = vpack.c.bf16 %v830_v42, %v830_v42  ;;  %v1333_v57 = vld [vmem:[%s1585_s4] ss:$0 sm:$0xff] }
  0xf4   :  { %v858_v0 = vmul.f32 0.796875, %v856_v59  ;;  %v851_v1 = vunpack.c.l.bf16 %v849_v60  ;;  %v833_v51 = vpack.c.bf16 %v831_v43, %v831_v43 }
  0xf5   :  { %v635_v3 = vmul.f32 0.796875, %v633_v61  ;;  %v432_v17 = vpack.c.bf16 %v431_v11, %v430_v9  ;;  %v874_v58 = vunpack.c.l.bf16 %v832_v50 }
  0xf6   :  { %v860_v6 = vpack.c.bf16 %v858_v0, %v858_v0  ;;  %v853_v7 = vadd.f32 %v851_v1, %v1555_v47  ;;  %v875_v59 = vunpack.c.l.bf16 %v833_v51 }
  0xf7   :  { %v637_v8 = vpack.c.bf16 %v635_v3, %v635_v3  ;;  %508 = vmatmul.bf16.vlgmr.msra.gmra.mxu3 %v432_v17 }
  0xf8   :  { %v862_v12 = vunpack.c.l.bf16 %v860_v6  ;;  %v855_v13 = vpack.c.bf16 %v853_v7, %v853_v7 }
  0xf9   :  { %v1343_v14 = vpop.eup %1342  ;;  %v639_v16 = vunpack.c.l.bf16 %v637_v8 }
  0xfa   :  { %v857_v18 = vunpack.c.l.bf16 %v855_v13  ;;  %v642_v20 = vpack.c.bf16 %v1343_v14, %v1343_v14  ;;  %1344 = vtanh.f32 %v862_v12 }
  0xfb   :  { %1346 = vtanh.f32 %v639_v16 }
  0xfc   :  { %v859_v21 = vmul.f32 0.796875, %v857_v18  ;;  %v644_v22 = vunpack.c.l.bf16 %v642_v20 }
  0xfe   :  { %v861_v23 = vpack.c.bf16 %v859_v21, %v859_v21  ;;  %v646_v26 = vadd.f32 1.0, %v644_v22 }
 0x100   :  { %v1345_v24 = vpop.eup %1344  ;;  %v863_v25 = vunpack.c.l.bf16 %v861_v23  ;;  %v648_v34 = vpack.c.bf16 %v646_v26, %v646_v26 }
 0x101   :  { %v1347_v27 = vpop.eup %1346  ;;  %v866_v28 = vpack.c.bf16 %v1345_v24, %v1345_v24 }
 0x102   :  { %v643_v31 = vpack.c.bf16 %v1347_v27, %v1347_v27  ;;  %1348 = vtanh.f32 %v863_v25  ;;  %v652_v40 = vunpack.c.l.bf16 %v648_v34 }
 0x103   :  { %v868_v32 = vunpack.c.l.bf16 %v866_v28 }
 0x104   :  { %v645_v33 = vunpack.c.l.bf16 %v643_v31  ;;  %v654_v10 = vmul.f32 %v652_v40, %v650_v53 }
 0x105   :  { %v870_v37 = vadd.f32 1.0, %v868_v32 }
 0x106   :  { %v647_v36 = vadd.f32 1.0, %v645_v33 }
 0x107   :  { %v872_v48 = vpack.c.bf16 %v870_v37, %v870_v37 }
 0x108   :  { %v1349_v38 = vpop.eup %1348  ;;  %v649_v39 = vpack.c.bf16 %v647_v36, %v647_v36 }
 0x109   :  { %v867_v44 = vpack.c.bf16 %v1349_v38, %v1349_v38  ;;  %v876_v56 = vunpack.c.l.bf16 %v872_v48 }
 0x10a   :  { %v653_v19 = vunpack.c.l.bf16 %v649_v39 }
 0x10b   :  { %v869_v46 = vunpack.c.l.bf16 %v867_v44  ;;  %v878_v60 = vmul.f32 %v876_v56, %v874_v58 }
 0x10c   :  { %v655_v49 = vmul.f32 %v653_v19, %v651_v45 }
 0x10d   :  { %v871_v52 = vadd.f32 1.0, %v869_v46 }
 0x10e   :  { %v656_v41 = vpack.c.bf16 %v655_v49, %v654_v10 }
 0x10f   :  { %v873_v55 = vpack.c.bf16 %v871_v52, %v871_v52 }
 0x110   :  { %732 = vmatmul.bf16.vlgmr.msrb.gmra.mxu1 %v656_v41 }
 0x111   :  { %v877_v15 = vunpack.c.l.bf16 %v873_v55 }
 0x113   :  { %v879_v47 = vmul.f32 %v877_v15, %v875_v59 }
 0x115   :  { %v880_v61 = vpack.c.bf16 %v879_v47, %v878_v60 }
 0x117   :  { %956 = vmatmul.bf16.vlgmr.msrb.gmra.mxu3 %v880_v61 }
 0x16d   :  { %v285_v62 = vpop.f32.mrf.mxu1 }
 0x175   :  { %v287_v0 = vpop.f32.mrf.mxu1 }
 0x17a   :  { %v509_v63 = vpop.f32.mrf.mxu3 }
 0x17b   :  { %v514_v3 = vadd.f32 %v509_v63, %v285_v62 }
 0x182   :  { %v511_v1 = vpop.f32.mrf.mxu3 }
 0x183   :  { %v515_v9 = vadd.f32 %v511_v1, %v287_v0 }
 0x18d   :  { %v733_v2 = vpop.f32.mrf.mxu1 }
 0x18e   :  { %v738_v4 = vadd.f32 %v733_v2, %v514_v3 }
 0x195   :  { %v735_v8 = vpop.f32.mrf.mxu1 }
 0x196   :  { %v739_v11 = vadd.f32 %v735_v8, %v515_v9 }
 0x19a   :  { %v957_v5 = vpop.f32.mrf.mxu3 }
 0x19b   :  { %v962_v6 = vadd.f32 %v957_v5, %v738_v4 }
 0x19d   :  { %v972_v7 = vadd.f32 %v1333_v57, %v962_v6 }
 0x19f   :  { %974 = vst [vmem:[#allocation9] sm:$0xff] %v972_v7 }
 0x1a2   :  { %v959_v12 = vpop.f32.mrf.mxu3 }
 0x1a3   :  { %v963_v13 = vadd.f32 %v959_v12, %v739_v11 }
 0x1a5   :  { %v973_v14 = vadd.f32 %v1333_v57, %v963_v13 }
 0x1a7   :  { %975 = vst [vmem:[#allocation9 + $0x8] sm:$0xff] %v973_v14 }
 0x1a8   :  { %988 = dma.vmem_to_hbm [thread:$0]  %s981_s21, 256, %s983_s24, [#allocation5], %s1456_s30, %s1456_s30, %s1457_s6  }
 0x1a9   :  { %1450 = dma.done.wait [#allocation5], 256  }
 0x1aa   :  { %1451 = vsyncadd [#allocation5], 4294967040 }
 0x1ab   :  { %993 = vsyncpa [#allocation4], 1 }
 0x1ac   :  { %994 = vsyncpa [#allocation7], 1 }
 0x1ad   :  { %995 = vsyncpa [#allocation5], 1 }

</bundles_post_ra>
